<compile_context>
chip_gen: v5e
topology: v5e:2x2
jax: 0.10.0
libtpu: 0.0.40
codegen_flags: <defaults>
</compile_context>

<pallas_src>
import functools

import jax
import jax.numpy as jnp
from jax import lax
from jax.experimental import pallas as pl
from jax.experimental.pallas import tpu as pltpu


def _fc_focal_kernel(x_ref, w_ref, b_ref, tag_ref, mask_ref, bidx_ref,
                     probs_ref, loss_ref, *, gamma, batch):
    """Whole problem in one invocation: fc -> softmax -> focal NLL."""
    # ---- fc: one batched GEMM over all timesteps ------------------------
    x = x_ref[...]                                             # (S*B, E)
    logits = jnp.dot(x, w_ref[...],
                     preferred_element_type=jnp.float32) + b_ref[...]   # (S*B, Cp)
    # padded class columns carry a -1e30 bias -> exp() underflows to 0 below.

    # ---- softmax over (padded) class dim --------------------------------
    m = jnp.max(logits, axis=-1, keepdims=True)
    e = jnp.exp(logits - m)
    s = jnp.sum(e, axis=-1, keepdims=True)
    inv = pl.reciprocal(s, approx=True)        # EUP slot (nearly free)
    inv = inv * (2.0 - s * inv)                # one Newton step -> full f32 accuracy
    probs = e * inv                                            # (S*B, Cp)
    probs_ref[...] = probs                                     # lane-dense store

    # ---- focal NLL (fc_nll_loss), fused epilogue -------------------------
    SB, Cp = probs.shape
    tag = tag_ref[...]                                         # (S*B, 1) int32
    cls = lax.broadcasted_iota(jnp.int32, (SB, Cp), 1)
    onehot = (cls == tag).astype(jnp.float32)                  # (S*B, Cp)
    p = jnp.sum(probs * onehot, axis=-1, keepdims=True)        # (S*B, 1) gather

    d = 1.0 - jnp.clip(p, 0.01, 0.99)
    if gamma == 2:                                             # specialized (no pow)
        g = d * d
    else:
        g = d ** gamma
    cost = -g * jnp.log(p + 1e-8)                              # (S*B, 1)

    msk = mask_ref[...]                                        # (S*B, 1)
    cm = cost * msk

    # batch-selector matrix: row i belongs to batch element bidx[i] = i % B
    bidx = bidx_ref[...]                                       # (S*B, 1) int32
    bcol = lax.broadcasted_iota(jnp.int32, (SB, batch), 1)
    sel = (bcol == bidx).astype(jnp.float32)                   # (S*B, B)

    num = jnp.sum(cm * sel, axis=0, keepdims=True)             # (1, B) sum_s cost*mask
    den = jnp.sum(msk * sel, axis=0, keepdims=True)            # (1, B) sum_s mask
    per_batch = num / den                                      # (1, B)
    loss_ref[...] = jnp.sum(per_batch, axis=1, keepdims=True) / batch   # (1, 1)


def fc_focal_loss_tpu(x, w, b, tags, mask, gamma=2):
    """x: (S,B,E) f32, w: (E,C) f32, b: (C,) f32, tags: (S,B) i32, mask: (S,B) f32.

    Returns (probs (S,B,C), loss_ft_fc scalar)."""
    S, B, E = x.shape
    C = w.shape[1]
    SB = S * B
    C_pad = max(128, ((C + 127) // 128) * 128)   # lane-dense class dim

    x2d = x.reshape(SB, E).astype(jnp.float32)
    # zero-pad weight columns; padded classes get -1e30 bias so softmax kills them
    w_pad = jnp.zeros((E, C_pad), jnp.float32).at[:, :C].set(w.astype(jnp.float32))
    b_pad = jnp.full((1, C_pad), -1e30, jnp.float32).at[0, :C].set(b.astype(jnp.float32))
    tag2d = tags.reshape(SB, 1).astype(jnp.int32)
    mask2d = mask.reshape(SB, 1).astype(jnp.float32)
    # batch index of each flattened row (row i of (S,B) row-major is batch i % B)
    bidx2d = jnp.tile(jnp.arange(B, dtype=jnp.int32), S).reshape(SB, 1)

    kernel = functools.partial(_fc_focal_kernel, gamma=gamma, batch=B)
    vmem = pl.BlockSpec(memory_space=pltpu.MemorySpace.VMEM)   # whole-array, resident

    probs_pad, loss = pl.pallas_call(
        kernel,
        out_shape=(jax.ShapeDtypeStruct((SB, C_pad), jnp.float32),
                   jax.ShapeDtypeStruct((1, 1), jnp.float32)),
        in_specs=[vmem] * 6,
        out_specs=(vmem, vmem),
    )(x2d, w_pad, b_pad, tag2d, mask2d, bidx2d)

    probs = probs_pad[:, :C].reshape(S, B, C)
    return probs, loss[0, 0]


def _reference(x, w, b, tags, mask, gamma=2):
    """Plain-JAX mirror of the PyTorch fc -> softmax -> fc_nll_loss path."""
    emis = jnp.einsum('sbe,ec->sbc', x, w) + b
    probs = jax.nn.softmax(emis, axis=-1)
    p = jnp.take_along_axis(probs, tags[..., None], axis=-1)[..., 0]   # (S,B)
    g = (1.0 - jnp.clip(p, 0.01, 0.99)) ** gamma
    cost = -g * jnp.log(p + 1e-8)
    cost = jnp.sum(cost * mask, axis=0) / jnp.sum(mask, axis=0)        # (B,)
    return probs, jnp.mean(cost)


if __name__ == "__main__":
    # small shapes consistent with the module:
    #   current_batch_size=4, seq_len=max_len+1=8, embedding_size=32, num_class=8
    B, S, E, C = 4, 8, 32, 8
    key = jax.random.PRNGKey(0)
    k1, k2, k3, k4 = jax.random.split(key, 4)

    # deterministic synthetic "BERT" sequence representation (eval: dropout = identity)
    x = jax.random.normal(k1, (S, B, E), jnp.float32)
    # deterministic fc parameters (nn.Linear(embedding_size, num_class))
    w = jax.random.normal(k2, (E, C), jnp.float32) * 0.1
    b = jax.random.normal(k3, (C,), jnp.float32) * 0.1
    # tag_matrix / mask_matrix, already transposed to (seq_len, batch) like the torch code
    tags = jax.random.randint(k4, (S, B), 0, C, jnp.int32)
    lens = jnp.array([8, 6, 7, 5], jnp.int32)
    mask = (jnp.arange(S)[:, None] < lens[None, :]).astype(jnp.float32)

    probs, loss = fc_focal_loss_tpu(x, w, b, tags, mask, gamma=2)
    jax.block_until_ready((probs, loss))

    probs_ref, loss_ref = _reference(x, w, b, tags, mask, gamma=2)
    assert jnp.allclose(probs, probs_ref, atol=1e-4, rtol=1e-4), "probs mismatch"
    assert jnp.allclose(loss, loss_ref, atol=1e-4, rtol=1e-4), "loss mismatch"

    print("KERNEL_OK")
</pallas_src>

<mosaic_0001>
module attributes {stable_mosaic.version = 11 : i64} {
  func.func @_fc_focal_kernel(%arg0: memref<32x32xf32, #tpu.memory_space<vmem>>, %arg1: memref<32x128xf32, #tpu.memory_space<vmem>>, %arg2: memref<1x128xf32, #tpu.memory_space<vmem>>, %arg3: memref<32x1xi32, #tpu.memory_space<vmem>>, %arg4: memref<32x1xf32, #tpu.memory_space<vmem>>, %arg5: memref<32x1xi32, #tpu.memory_space<vmem>>, %arg6: memref<32x128xf32, #tpu.memory_space<vmem>>, %arg7: memref<1x1xf32, #tpu.memory_space<vmem>>) attributes {dimension_semantics = [], scalar_prefetch = 0 : i64, scratch_operands = 0 : i64, tpu.core_type = #tpu.core_type<tc>} {
    %c0 = arith.constant 0 : index
    %c0_0 = arith.constant 0 : index
    %0 = vector.load %arg0[%c0, %c0_0] : memref<32x32xf32, #tpu.memory_space<vmem>>, vector<32x32xf32>
    %c0_1 = arith.constant 0 : index
    %c0_2 = arith.constant 0 : index
    %1 = vector.load %arg1[%c0_1, %c0_2] : memref<32x128xf32, #tpu.memory_space<vmem>>, vector<32x128xf32>
    %cst = arith.constant dense<0.000000e+00> : vector<32x128xf32>
    %2 = tpu.matmul %0, %1, %cst {dimension_numbers = #tpu.dot_dimension_numbers<[1], [0], [0], [1], [0, 0, 1, 1], [], []>} : vector<32x32xf32>, vector<32x128xf32>, vector<32x128xf32> -> vector<32x128xf32>
    %c0_3 = arith.constant 0 : index
    %c0_4 = arith.constant 0 : index
    %3 = vector.load %arg2[%c0_3, %c0_4] : memref<1x128xf32, #tpu.memory_space<vmem>>, vector<1x128xf32>
    %4 = vector.broadcast %3 : vector<1x128xf32> to vector<32x128xf32>
    %5 = arith.addf %2, %4 : vector<32x128xf32>
    %cst_5 = arith.constant dense<0xFF800000> : vector<32xf32>
    %6 = vector.multi_reduction <maximumf>, %5, %cst_5 [1] : vector<32x128xf32> to vector<32xf32>
    %7 = vector.shape_cast %6 : vector<32xf32> to vector<32x1xf32>
    %8 = vector.broadcast %7 : vector<32x1xf32> to vector<32x128xf32>
    %9 = arith.subf %5, %8 : vector<32x128xf32>
    %10 = math.exp %9 : vector<32x128xf32>
    %cst_6 = arith.constant dense<0.000000e+00> : vector<32xf32>
    %11 = vector.multi_reduction <add>, %10, %cst_6 [1] : vector<32x128xf32> to vector<32xf32>
    %12 = vector.shape_cast %11 : vector<32xf32> to vector<32x1xf32>
    %13 = tpu.reciprocal %12 {approx = true} : vector<32x1xf32> -> vector<32x1xf32>
    %14 = arith.mulf %12, %13 : vector<32x1xf32>
    %cst_7 = arith.constant 2.000000e+00 : f32
    %15 = vector.broadcast %cst_7 : f32 to vector<32x1xf32>
    %16 = arith.subf %15, %14 : vector<32x1xf32>
    %17 = arith.mulf %13, %16 : vector<32x1xf32>
    %18 = vector.broadcast %17 : vector<32x1xf32> to vector<32x128xf32>
    %19 = arith.mulf %10, %18 : vector<32x128xf32>
    %c0_8 = arith.constant 0 : index
    %c0_9 = arith.constant 0 : index
    %20 = vector.load %arg6[%c0_8, %c0_9] : memref<32x128xf32, #tpu.memory_space<vmem>>, vector<32x128xf32>
    tpu.vector_store %arg6[%c0_8, %c0_9], %19 {strides = array<i32>} : memref<32x128xf32, #tpu.memory_space<vmem>>, vector<32x128xf32>,
    %c0_10 = arith.constant 0 : index
    %c0_11 = arith.constant 0 : index
    %21 = vector.load %arg3[%c0_10, %c0_11] : memref<32x1xi32, #tpu.memory_space<vmem>>, vector<32x1xi32>
    %22 = tpu.iota {dimensions = array<i32: 1>} : vector<32x128xi32>
    %23 = vector.broadcast %21 : vector<32x1xi32> to vector<32x128xi32>
    %24 = arith.cmpi eq, %22, %23 : vector<32x128xi32>
    %25 = arith.extui %24 : vector<32x128xi1> to vector<32x128xi32>
    %26 = arith.sitofp %25 : vector<32x128xi32> to vector<32x128xf32>
    %27 = arith.mulf %19, %26 : vector<32x128xf32>
    %cst_12 = arith.constant dense<0.000000e+00> : vector<32xf32>
    %28 = vector.multi_reduction <add>, %27, %cst_12 [1] : vector<32x128xf32> to vector<32xf32>
    %29 = vector.shape_cast %28 : vector<32xf32> to vector<32x1xf32>
    %cst_13 = arith.constant 0.00999999977 : f32
    %cst_14 = arith.constant 9.900000e-01 : f32
    %30 = vector.broadcast %cst_13 : f32 to vector<32x1xf32>
    %31 = arith.maximumf %30, %29 : vector<32x1xf32>
    %32 = vector.broadcast %cst_14 : f32 to vector<32x1xf32>
    %33 = arith.minimumf %32, %31 : vector<32x1xf32>
    %cst_15 = arith.constant 1.000000e+00 : f32
    %34 = vector.broadcast %cst_15 : f32 to vector<32x1xf32>
    %35 = arith.subf %34, %33 : vector<32x1xf32>
    %36 = arith.mulf %35, %35 : vector<32x1xf32>
    %cst_16 = arith.constant 0.000000e+00 : f32
    %37 = vector.broadcast %cst_16 : f32 to vector<32x1xf32>
    %38 = arith.subf %37, %36 : vector<32x1xf32>
    %cst_17 = arith.constant 9.99999993E-9 : f32
    %39 = vector.broadcast %cst_17 : f32 to vector<32x1xf32>
    %40 = arith.addf %29, %39 : vector<32x1xf32>
    %41 = math.log %40 : vector<32x1xf32>
    %42 = arith.mulf %38, %41 : vector<32x1xf32>
    %c0_18 = arith.constant 0 : index
    %c0_19 = arith.constant 0 : index
    %43 = vector.load %arg4[%c0_18, %c0_19] : memref<32x1xf32, #tpu.memory_space<vmem>>, vector<32x1xf32>
    %44 = arith.mulf %42, %43 : vector<32x1xf32>
    %c0_20 = arith.constant 0 : index
    %c0_21 = arith.constant 0 : index
    %45 = vector.load %arg5[%c0_20, %c0_21] : memref<32x1xi32, #tpu.memory_space<vmem>>, vector<32x1xi32>
    %46 = tpu.iota {dimensions = array<i32: 1>} : vector<32x4xi32>
    %47 = vector.broadcast %45 : vector<32x1xi32> to vector<32x4xi32>
    %48 = arith.cmpi eq, %46, %47 : vector<32x4xi32>
    %49 = arith.extui %48 : vector<32x4xi1> to vector<32x4xi32>
    %50 = arith.sitofp %49 : vector<32x4xi32> to vector<32x4xf32>
    %51 = vector.broadcast %44 : vector<32x1xf32> to vector<32x4xf32>
    %52 = arith.mulf %51, %50 : vector<32x4xf32>
    %cst_22 = arith.constant dense<0.000000e+00> : vector<4xf32>
    %53 = vector.multi_reduction <add>, %52, %cst_22 [0] : vector<32x4xf32> to vector<4xf32>
    %54 = vector.shape_cast %53 : vector<4xf32> to vector<1x4xf32>
    %55 = vector.broadcast %43 : vector<32x1xf32> to vector<32x4xf32>
    %56 = arith.mulf %55, %50 : vector<32x4xf32>
    %cst_23 = arith.constant dense<0.000000e+00> : vector<4xf32>
    %57 = vector.multi_reduction <add>, %56, %cst_23 [0] : vector<32x4xf32> to vector<4xf32>
    %58 = vector.shape_cast %57 : vector<4xf32> to vector<1x4xf32>
    %59 = arith.divf %54, %58 : vector<1x4xf32>
    %cst_24 = arith.constant dense<0.000000e+00> : vector<1xf32>
    %60 = vector.multi_reduction <add>, %59, %cst_24 [1] : vector<1x4xf32> to vector<1xf32>
    %61 = vector.shape_cast %60 : vector<1xf32> to vector<1x1xf32>
    %cst_25 = arith.constant 4.000000e+00 : f32
    %62 = vector.broadcast %cst_25 : f32 to vector<1x1xf32>
    %63 = arith.divf %61, %62 : vector<1x1xf32>
    %c0_26 = arith.constant 0 : index
    %c0_27 = arith.constant 0 : index
    %64 = vector.load %arg7[%c0_26, %c0_27] : memref<1x1xf32, #tpu.memory_space<vmem>>, vector<1x1xf32>
    tpu.vector_store %arg7[%c0_26, %c0_27], %63 {strides = array<i32>} : memref<1x1xf32, #tpu.memory_space<vmem>>, vector<1x1xf32>,
    return
  }
}

</mosaic_0001>

<bundles_post_ra>
// kernel: tpu_custom_call.1
= control target key start
LH: loop header
LB: loop body
LE: loop exit
PB: predicated region body
PF: predicated region fallthrough
CT: control target
= control target key end

     0   :  { %13 = vsyncpa [#allocation3], 0  ;;  %s665_s0 = inlined_call_operand.vmem [shape: f32[32,32], index: 0, kind: input, shape index: {}]   ;;  %s666_s1 = inlined_call_operand.vmem [shape: f32[32,128], index: 1, kind: input, shape index: {}]   ;;  %s667_s2 = inlined_call_operand.vmem [shape: f32[1,128], index: 2, kind: input, shape index: {}]   ;;  %s668_s3 = inlined_call_operand.vmem [shape: s32[32,1], index: 3, kind: input, shape index: {}]   ;;  %s669_s4 = inlined_call_operand.vmem [shape: f32[32,1], index: 4, kind: input, shape index: {}]   ;;  %s670_s5 = inlined_call_operand.vmem [shape: s32[32,1], index: 5, kind: input, shape index: {}]   ;;  %s671_s6 = inlined_call_operand.hbm [shape: f32[32,128], index: 6, kind: output, shape index: {0}]   ;;  %s672_s7 = inlined_call_operand.hbm [shape: f32[1,1], index: 7, kind: output, shape index: {1}]  }
   0x1   :  { %v34_v0 = vld [vmem:[%s666_s1 + $0x18] sm:$0xff]  ;;  %v33_v1 = vld [vmem:[%s666_s1 + $0x10] sm:$0xff]  ;;  %v32_v2 = vld [vmem:[%s666_s1 + $0x8] sm:$0xff] }
   0x2   :  { %64 = vmatpush.msra.mxu0 %v34_v0  ;;  %397 = vmatpush.msra.mxu2 %v34_v0 }
   0x3   :  { %396 = vmatpush.msra.mxu1 %v34_v0  ;;  %398 = vmatpush.msra.mxu3 %v34_v0 }
   0x4   :  { %65 = vmatpush.msra.mxu0 %v33_v1  ;;  %400 = vmatpush.msra.mxu2 %v33_v1 }
   0x5   :  { %14 = vsyncpa [#allocation5], 0  ;;  %v31_v3 = vld [vmem:[%s666_s1] sm:$0xff]  ;;  %399 = vmatpush.msra.mxu1 %v33_v1  ;;  %401 = vmatpush.msra.mxu3 %v33_v1  ;;  %vm39_vm0 = vcmask 261120   ;;  %v29_v5 = vld [vmem:[%s665_s0 + $0x10] sm:$0xff]  ;;  %v499_v9 = vmov 0   ;;  %v137_v49 = vlaneseq }
   0x6   :  { %66 = vmatpush.msra.mxu0 %v32_v2  ;;  %403 = vmatpush.msra.mxu2 %v32_v2  ;;  %v27_v4 = vld [vmem:[%s665_s0] sm:$0xff]  ;;  %v28_v6 = vld [vmem:[%s665_s0 + $0x8] sm:$0xff]  ;;  %v30_v7 = vld [vmem:[%s665_s0 + $0x18] sm:$0xff]  ;;  %v500_v63 = vmov 0.0   ;;  %vm271_vm9 = vcmask 31744   ;;  %s356_s17 = sshll.u32 %s671_s6, 4  ;;  %s357_s17 = int_to_ptr.hbm [resolvable:$true] %s356_s17 }
   0x7   :  { %402 = vmatpush.msra.mxu1 %v32_v2  ;;  %404 = vmatpush.msra.mxu3 %v32_v2  ;;  %v135_v8 = vld [vmem:[%s668_s3 + $0x10] sm:$0xff]  ;;  %v418_v10 = vld [vmem:[%s667_s2] ss:$0 sm:$0xff]  ;;  %v136_v20 = vld [vmem:[%s668_s3 + $0x18] sm:$0xff]  ;;  %v612_v55 = vand.u32 127, %v137_v49  ;;  %s502_s18 = smov 128  }
   0x8   :  { %67 = vmatpush.msra.mxu0 %v31_v3  ;;  %406 = vmatpush.msra.mxu2 %v31_v3  ;;  %v133_v18 = vld [vmem:[%s668_s3] sm:$0xff]  ;;  %v220_v21 = vld [vmem:[%s670_s5 + $0x8] sm:$0xff]  ;;  %v221_v41 = vld [vmem:[%s670_s5 + $0x10] sm:$0xff]  ;;  %s503_s19 = smov 8   ;;  %s505_s6 = smov [#allocation4]   ;;  %vm348_vm15 = vcmask 0  }
   0x9   :  { %384 = vmatmul.msk.f32.vlgmr.msra.gmra.mxu0 %vm39_vm0, %v27_v4  ;;  %386 = vmatmul.msk.f32.vlgmr.msra.gmra.mxu2 %vm39_vm0, %v29_v5  ;;  %v134_v22 = vld [vmem:[%s668_s3 + $0x8] sm:$0xff]  ;;  %v219_v23 = vld [vmem:[%s670_s5] sm:$0xff]  ;;  %s368_s0 = sshll.u32 %s505_s6, 4  ;;  %s370_s22 = sshll.u32 %s672_s7, 4  ;;  %s369_s0 = int_to_ptr.vmem [resolvable:$true] %s368_s0  ;;  %s371_s22 = int_to_ptr.hbm [resolvable:$true] %s370_s22 }
   0xa   :  { %405 = vmatpush.msra.mxu1 %v31_v3  ;;  %407 = vmatpush.msra.mxu3 %v31_v3  ;;  %v599_v42 = vld [vmem:[%s669_s4 + $0x8] sm:$0xff]  ;;  %v605_v43 = vld [vmem:[%s669_s4] sm:$0xff] }
   0xb   :  { %385 = vmatmul.msk.f32.vlgmr.msra.gmra.mxu1 %vm39_vm0, %v28_v6  ;;  %387 = vmatmul.msk.f32.vlgmr.msra.gmra.mxu3 %vm39_vm0, %v30_v7 }
   0xc   :  { %417 = vset.pattern.permute.xlu1 %v499_v9  ;;  %415 = vset.pattern.permute.xlu2 %v499_v9 }
   0xd   :  { %146 = vperm.xlu1 %417, %v135_v8   ;;  %416 = vset.pattern.permute.xlu0 %v499_v9 }
   0xe   :  { %140 = vperm.xlu2 %415, %v133_v18  }
  0x16   :  { %149 = vperm.xlu2 %415, %v136_v20   ;;  %v213_v20 = vld [vmem:[%s669_s4 + $0x10] sm:$0xff] }
  0x1e   :  { %227 = vperm.xlu2 %415, %v220_v21   ;;  %v222_v21 = vld [vmem:[%s670_s5 + $0x18] sm:$0xff] }
  0x68   :  { %v141_v44 = vpop.permute.xlu2 %140 }
  0x69   :  { %vm151_vm1 = vcmp.eq.s32.totalorder %v612_v55, %v141_v44 }
  0x6a   :  { %v388_v0 = vsel %vm151_vm1, 1.0, %v500_v63 }
  0x70   :  { %v150_v45 = vpop.permute.xlu2 %149 }
  0x71   :  { %vm154_vm4 = vcmp.eq.s32.totalorder %v612_v55, %v150_v45 }
  0x72   :  { %v391_v18 = vsel %vm154_vm4, 1.0, %v500_v63 }
  0x78   :  { %v608_v46 = vpop.permute.xlu2 %227 }
  0x79   :  { %vm236_vm6 = vcmp.eq.s32.totalorder %v612_v55, %v608_v46 }
  0x7f   :  { %v591_v24 = vpop.permute.xlu1 %146 }
  0x80   :  { %vm153_vm2 = vcmp.eq.s32.totalorder %v612_v55, %v591_v24 }
  0x81   :  { %v390_v9 = vsel %vm153_vm2, 1.0, %v500_v63 }
  0x86   :  { %v69_v11 = vpop.f32.mrf.mxu0 }
  0x87   :  { %v70_v12 = vadd.f32 %v418_v10, %v69_v11 }
  0x88   :  { %v72_v13 = vpop.f32.mrf.mxu1 }
  0x89   :  { %81 = vmax.xlane.f32.xlu0 %v70_v12  ;;  %v73_v16 = vadd.f32 %v418_v10, %v72_v13 }
  0x8c   :  { %v75_v14 = vpop.f32.mrf.mxu2 }
  0x8d   :  { %v76_v15 = vadd.f32 %v418_v10, %v75_v14 }
  0x8e   :  { %v78_v17 = vpop.f32.mrf.mxu3 }
  0x8f   :  { %85 = vmax.xlane.f32.xlu1 %v76_v15  ;;  %v79_v19 = vadd.f32 %v418_v10, %v78_v17 }
  0x91   :  { %83 = vmax.xlane.f32.xlu0 %v73_v16 }
  0x97   :  { %87 = vmax.xlane.f32.xlu1 %v79_v19 }
  0xa5   :  { %143 = vperm.xlu0 %416, %v134_v22   ;;  %v214_v22 = vld [vmem:[%s669_s4 + $0x18] sm:$0xff]  ;;  %s501_s4 = smov [#allocation2]  }
  0xa6   :  { %s354_s5 = sshll.u32 %s501_s4, 4  ;;  %s355_s5 = int_to_ptr.vmem [resolvable:$true] %s354_s5 }
  0xb0   :  { %224 = vperm.xlu1 %417, %v219_v23  }
  0xfc   :  { %v82_v25 = vpop.xlane.xlu0 %81 }
  0xfd   :  { %v89_v26 = vsub.f32 %v70_v12, %v82_v25 }
  0xff   :  { %v93_v27 = vmul.f32 1.442695, %v89_v26 }
 0x101   :  { %419 = vpow2.f32 %v93_v27 }
 0x102   :  { %v86_v28 = vpop.xlane.xlu1 %85 }
 0x103   :  { %v91_v29 = vsub.f32 %v76_v15, %v86_v28 }
 0x104   :  { %v84_v30 = vpop.xlane.xlu0 %83 }
 0x105   :  { %v97_v31 = vmul.f32 1.442695, %v91_v29  ;;  %v90_v32 = vsub.f32 %v73_v16, %v84_v30 }
 0x107   :  { %v420_v33 = vpop.eup %419  ;;  %421 = vpow2.f32 %v97_v31  ;;  %v95_v34 = vmul.f32 1.442695, %v90_v32 }
 0x108   :  { %101 = vadd.xlane.f32.xlu2 %v420_v33 }
 0x109   :  { %423 = vpow2.f32 %v95_v34 }
 0x10a   :  { %v88_v35 = vpop.xlane.xlu1 %87 }
 0x10b   :  { %v92_v36 = vsub.f32 %v79_v19, %v88_v35 }
 0x10d   :  { %v422_v37 = vpop.eup %421  ;;  %v99_v38 = vmul.f32 1.442695, %v92_v36 }
 0x10e   :  { %105 = vadd.xlane.f32.xlu0 %v422_v37 }
 0x10f   :  { %v424_v39 = vpop.eup %423  ;;  %425 = vpow2.f32 %v99_v38 }
 0x110   :  { %103 = vadd.xlane.f32.xlu2 %v424_v39 }
 0x115   :  { %v426_v40 = vpop.eup %425 }
 0x116   :  { %107 = vadd.xlane.f32.xlu1 %v426_v40 }
 0x117   :  { %v144_v47 = vpop.permute.xlu0 %143 }
 0x118   :  { %vm152_vm3 = vcmp.eq.s32.totalorder %v612_v55, %v144_v47 }
 0x119   :  { %v389_v13 = vsel %vm152_vm3, 1.0, %v500_v63 }
 0x122   :  { %230 = vperm.xlu0 %416, %v221_v41   ;;  %v610_v50 = vpop.permute.xlu1 %224 }
 0x123   :  { %vm235_vm5 = vcmp.eq.s32.totalorder %v612_v55, %v610_v50 }
 0x128   :  { %292 = vperm.xlu2 %415, %v599_v42  }
 0x12f   :  { %287 = vperm.xlu1 %417, %v605_v43  }
 0x17b   :  { %v102_v48 = vpop.xlane.xlu2 %101 }
 0x17c   :  { %427 = vrcp.f32 %v102_v48 }
 0x181   :  { %v106_v51 = vpop.xlane.xlu0 %105 }
 0x182   :  { %v428_v52 = vpop.eup %427  ;;  %429 = vrcp.f32 %v106_v51 }
 0x183   :  { %v113_v53 = vmul.f32 %v428_v52, %v102_v48  ;;  %v104_v54 = vpop.xlane.xlu2 %103 }
 0x184   :  { %431 = vrcp.f32 %v104_v54 }
 0x185   :  { %v117_v56 = vsub.f32 2.0, %v113_v53 }
 0x187   :  { %v121_v57 = vmul.f32 %v428_v52, %v117_v56 }
 0x188   :  { %v430_v58 = vpop.eup %429 }
 0x189   :  { %v115_v59 = vmul.f32 %v430_v58, %v106_v51  ;;  %v108_v60 = vpop.xlane.xlu1 %107  ;;  %v125_v61 = vmul.f32 %v420_v33, %v121_v57 }
 0x18a   :  { %v432_v62 = vpop.eup %431  ;;  %433 = vrcp.f32 %v108_v60 }
 0x18b   :  { %v119_v1 = vsub.f32 2.0, %v115_v59  ;;  %v114_v2 = vmul.f32 %v432_v62, %v104_v54  ;;  %129 = vst [vmem:[#allocation2] sm:$0xff] %v125_v61  ;;  %v163_v3 = vmul.f32 %v388_v0, %v125_v61  ;;  %v632_v23 = vpop.permute.xlu2 %292 }
 0x18d   :  { %v123_v4 = vmul.f32 %v430_v58, %v119_v1  ;;  %v118_v5 = vsub.f32 2.0, %v114_v2  ;;  %167 = vadd.xlane.f32.xlu2 %v163_v3 }
 0x18f   :  { %v122_v6 = vmul.f32 %v432_v62, %v118_v5  ;;  %v127_v7 = vmul.f32 %v422_v37, %v123_v4 }
 0x190   :  { %v434_v8 = vpop.eup %433 }
 0x191   :  { %v116_v10 = vmul.f32 %v434_v8, %v108_v60  ;;  %v165_v11 = vmul.f32 %v390_v9, %v127_v7  ;;  %131 = vst [vmem:[#allocation2 + $0x10] sm:$0xff] %v127_v7  ;;  %v126_v12 = vmul.f32 %v424_v39, %v122_v6 }
 0x193   :  { %v120_v14 = vsub.f32 2.0, %v116_v10  ;;  %171 = vadd.xlane.f32.xlu0 %v165_v11  ;;  %130 = vst [vmem:[#allocation2 + $0x8] sm:$0xff] %v126_v12  ;;  %v164_v15 = vmul.f32 %v389_v13, %v126_v12  ;;  %v392_v12 = vsel %vm235_vm5, 1.0, %v500_v63 }
 0x194   :  { %v634_v24 = vpop.permute.xlu0 %230 }
 0x195   :  { %v124_v16 = vmul.f32 %v434_v8, %v120_v14  ;;  %169 = vadd.xlane.f32.xlu1 %v164_v15  ;;  %vm237_vm7 = vcmp.eq.s32.totalorder %v612_v55, %v634_v24  ;;  %v393_v14 = vsel %vm236_vm6, 1.0, %v500_v63 }
 0x196   :  { %v394_v15 = vsel %vm237_vm7, 1.0, %v500_v63  ;;  %v306_v50 = vmul.f32 %v393_v14, %v632_v23 }
 0x197   :  { %v128_v17 = vmul.f32 %v426_v40, %v124_v16 }
 0x199   :  { %132 = vst [vmem:[#allocation2 + $0x18] sm:$0xff] %v128_v17  ;;  %v166_v19 = vmul.f32 %v391_v18, %v128_v17 }
 0x19a   :  { %362 = dma.vmem_to_hbm [thread:$0]  %s355_s5, 512, %s357_s17, [#allocation3], %s502_s18, %s502_s18, %s503_s19  }
 0x19b   :  { %173 = vadd.xlane.f32.xlu2 %v166_v19 }
 0x1a1   :  { %v288_v25 = vpop.permute.xlu1 %287 }
 0x1a2   :  { %v305_v13 = vmul.f32 %v392_v12, %v288_v25 }
 0x1a4   :  { %v309_v18 = vsel %vm271_vm9, %v305_v13, 0.0 }
 0x1a7   :  { %297 = vperm.xlu0 %416, %v213_v20  }
 0x1ae   :  { %233 = vperm.xlu1 %417, %v222_v21  }
 0x1b3   :  { %302 = vperm.xlu2 %415, %v214_v22  }
 0x200   :  { %v168_v26 = vpop.xlane.xlu2 %167 }
 0x201   :  { %v175_v27 = vmax.f32 %v168_v26, 0.01  ;;  %v195_v28 = vadd.f32 1e-08, %v168_v26 }
 0x203   :  { %v179_v29 = vmin.f32 %v175_v27, 0.99  ;;  %435 = vlog2.f32 %v195_v28 }
 0x205   :  { %v183_v30 = vsub.f32 1.0, %v179_v29 }
 0x206   :  { %v172_v31 = vpop.xlane.xlu0 %171 }
 0x207   :  { %v187_v32 = vmul.f32 %v183_v30, %v183_v30  ;;  %v177_v33 = vmax.f32 %v172_v31, 0.01  ;;  %v197_v34 = vadd.f32 1e-08, %v172_v31 }
 0x208   :  { %v170_v35 = vpop.xlane.xlu1 %169 }
 0x209   :  { %v436_v36 = vpop.eup %435  ;;  %v191_v37 = vsub.f32 0.0, %v187_v32  ;;  %v181_v38 = vmin.f32 %v177_v33, 0.99  ;;  %437 = vlog2.f32 %v197_v34  ;;  %v176_v39 = vmax.f32 %v170_v35, 0.01 }
 0x20a   :  { %v200_v40 = vmul.f32 0.6931472, %v436_v36  ;;  %v196_v41 = vadd.f32 1e-08, %v170_v35 }
 0x20b   :  { %v185_v44 = vsub.f32 1.0, %v181_v38  ;;  %v180_v45 = vmin.f32 %v176_v39, 0.99 }
 0x20c   :  { %v207_v47 = vmul.f32 %v200_v40, %v191_v37  ;;  %439 = vlog2.f32 %v196_v41 }
 0x20d   :  { %v189_v48 = vmul.f32 %v185_v44, %v185_v44  ;;  %v184_v49 = vsub.f32 1.0, %v180_v45 }
 0x20e   :  { %v174_v51 = vpop.xlane.xlu2 %173  ;;  %v215_v52 = vmul.f32 %v605_v43, %v207_v47 }
 0x20f   :  { %v438_v53 = vpop.eup %437  ;;  %v193_v54 = vsub.f32 0.0, %v189_v48  ;;  %v188_v56 = vmul.f32 %v184_v49, %v184_v49  ;;  %v178_v57 = vmax.f32 %v174_v51, 0.01  ;;  %v198_v58 = vadd.f32 1e-08, %v174_v51 }
 0x210   :  { %v204_v59 = vmul.f32 0.6931472, %v438_v53  ;;  %249 = vperm.xlu1 %417, %v215_v52  }
 0x211   :  { %v192_v60 = vsub.f32 0.0, %v188_v56  ;;  %v182_v61 = vmin.f32 %v178_v57, 0.99  ;;  %441 = vlog2.f32 %v198_v58 }
 0x212   :  { %v440_v62 = vpop.eup %439  ;;  %v209_v0 = vmul.f32 %v204_v59, %v193_v54 }
 0x213   :  { %v202_v1 = vmul.f32 0.6931472, %v440_v62  ;;  %v186_v2 = vsub.f32 1.0, %v182_v61 }
 0x214   :  { %v217_v3 = vmul.f32 %v213_v20, %v209_v0 }
 0x215   :  { %v208_v4 = vmul.f32 %v202_v1, %v192_v60  ;;  %v190_v5 = vmul.f32 %v186_v2, %v186_v2 }
 0x216   :  { %259 = vperm.xlu2 %415, %v217_v3   ;;  %v303_v46 = vpop.permute.xlu2 %302 }
 0x217   :  { %v442_v6 = vpop.eup %441  ;;  %v194_v43 = vsub.f32 0.0, %v190_v5  ;;  %v216_v7 = vmul.f32 %v599_v42, %v208_v4  ;;  %v504_v5 = vmov 4.0  }
 0x218   :  { %v206_v8 = vmul.f32 0.6931472, %v442_v6 }
 0x219   :  { %254 = vperm.xlu0 %416, %v216_v7   ;;  %v298_v42 = vpop.permute.xlu0 %297 }
 0x21a   :  { %v210_v9 = vmul.f32 %v206_v8, %v194_v43  ;;  %v307_v17 = vmul.f32 %v394_v15, %v298_v42 }
 0x21c   :  { %v218_v10 = vmul.f32 %v214_v22, %v210_v9  ;;  %v312_v20 = vsel %vm271_vm9, %v307_v17, 0.0 }
 0x21e   :  { %264 = vperm.xlu1 %417, %v218_v10  }
 0x220   :  { %v234_v11 = vpop.permute.xlu1 %233 }
 0x221   :  { %vm238_vm8 = vcmp.eq.s32.totalorder %v612_v55, %v234_v11  ;;  %v310_v55 = vsel %vm271_vm9, %v306_v50, 0.0 }
 0x222   :  { %v395_v16 = vsel %vm238_vm8, 1.0, %v500_v63  ;;  %v311_v21 = vadd.f32 %v310_v55, %v309_v18 }
 0x223   :  { %v308_v19 = vmul.f32 %v395_v16, %v303_v46 }
 0x224   :  { %v313_v24 = vadd.f32 %v312_v20, %v311_v21 }
 0x225   :  { %v314_v22 = vsel %vm271_vm9, %v308_v19, 0.0 }
 0x226   :  { %v315_v25 = vadd.f32 %v314_v22, %v313_v24 }
 0x228   :  { %v316_v26 = vrot.slane %v315_v25, 4 }
 0x22a   :  { %v317_v27 = vadd.f32 %v316_v26, %v315_v25 }
 0x22c   :  { %v318_v63 = vrot.slane %v317_v27, 2 }
 0x22e   :  { %v319_v28 = vadd.f32 %v318_v63, %v317_v27 }
 0x230   :  { %v320_v23 = vrot.slane %v319_v28, 1 }
 0x232   :  { %v321_v29 = vadd.f32 %v320_v23, %v319_v28 }
 0x234   :  { %443 = vrcp.f32 %v321_v29  ;;  %v333_v58 = vand.u32 2147483648, %v321_v29  ;;  %vm327_vm11 = vweird.f32 %v321_v29  ;;  %v331_v60 = vand.u32 2147483647, %v321_v29 }
 0x235   :  { %445 = vrcp.f32 %v504_v5 }
 0x236   :  { %v334_v0 = vor.u32 1.1754944e-38, %v333_v58  ;;  %vm332_vm13 = vcmp.eq.f32.partialorder %v331_v60, 8.507059e+37 }
 0x23a   :  { %v444_v33 = vpop.eup %443 }
 0x23b   :  { %v323_v39 = vmul.f32 %v444_v33, %v321_v29  ;;  %vm328_vm10 = vweird.f32 %v444_v33  ;;  %v446_v6 = vpop.eup %445 }
 0x23c   :  { %vm329_vm12 = vmor %vm327_vm11, %vm328_vm10  ;;  %v341_v43 = vmul.f32 4.0, %v446_v6  ;;  %vm345_vm14 = vweird.f32 %v446_v6 }
 0x23d   :  { %v324_v48 = vsub.f32 1.0, %v323_v39 }
 0x23e   :  { %v342_v7 = vsub.f32 1.0, %v341_v43 }
 0x23f   :  { %v325_v53 = vmul.f32 %v444_v33, %v324_v48 }
 0x240   :  { %v343_v8 = vmul.f32 %v446_v6, %v342_v7 }
 0x241   :  { %v326_v57 = vadd.f32 %v444_v33, %v325_v53 }
 0x242   :  { %v344_v9 = vadd.f32 %v446_v6, %v343_v8 }
 0x243   :  { %v330_v62 = vsel %vm329_vm12, %v444_v33, %v326_v57 }
 0x244   :  { %v335_v2 = vsel %vm332_vm13, %v334_v0, %v330_v62  ;;  %v346_v10 = vsel %vm345_vm14, %v446_v6, %v344_v9 }
 0x270   :  { %v260_v31 = vpop.permute.xlu2 %259 }
 0x271   :  { %v269_v36 = vmul.f32 %v394_v15, %v260_v31 }
 0x273   :  { %v275_v44 = vsel %vm271_vm9, %v269_v36, 0.0 }
 0x282   :  { %v250_v30 = vpop.permute.xlu1 %249 }
 0x283   :  { %v267_v32 = vmul.f32 %v392_v12, %v250_v30 }
 0x285   :  { %v272_v37 = vsel %vm271_vm9, %v267_v32, 0.0 }
 0x28b   :  { %v255_v34 = vpop.permute.xlu0 %254 }
 0x28c   :  { %v268_v35 = vmul.f32 %v393_v14, %v255_v34 }
 0x28e   :  { %v273_v38 = vsel %vm271_vm9, %v268_v35, 0.0 }
 0x28f   :  { %v274_v40 = vadd.f32 %v273_v38, %v272_v37 }
 0x290   :  { %v265_v41 = vpop.permute.xlu1 %264 }
 0x291   :  { %v270_v45 = vmul.f32 %v395_v16, %v265_v41  ;;  %v276_v47 = vadd.f32 %v275_v44, %v274_v40 }
 0x293   :  { %v277_v49 = vsel %vm271_vm9, %v270_v45, 0.0 }
 0x294   :  { %v278_v51 = vadd.f32 %v277_v49, %v276_v47 }
 0x296   :  { %v279_v52 = vrot.slane %v278_v51, 4 }
 0x298   :  { %v280_v54 = vadd.f32 %v279_v52, %v278_v51 }
 0x29a   :  { %v281_v56 = vrot.slane %v280_v54, 2 }
 0x29c   :  { %v282_v59 = vadd.f32 %v281_v56, %v280_v54 }
 0x29e   :  { %v283_v61 = vrot.slane %v282_v59, 1 }
 0x2a0   :  { %v284_v1 = vadd.f32 %v283_v61, %v282_v59 }
 0x2a2   :  { %v336_v3 = vmul.f32 %v335_v2, %v284_v1 }
 0x2a4   :  { %v337_v4 = vsel %vm271_vm9, %v336_v3, 0.0 }
 0x2a5   :  { %338 = vadd.xlane.f32.xlu0 %v337_v4 }
 0x318   :  { %v339_v11 = vpop.xlane.xlu0 %338 }
 0x319   :  { %v347_v12 = vmul.f32 %v346_v10, %v339_v11 }
 0x31b   :  { %349 = vst.msk [vmem:[#allocation4] sm:$0x1] %vm348_vm15, %v347_v12 }
 0x31c   :  { %373 = dma.vmem_to_hbm [thread:$0]  %s369_s0, 16, %s371_s22, [#allocation5]  }
 0x31d   :  { %495 = dma.done.wait [#allocation3], 512  }
 0x31e   :  { %496 = vsyncadd [#allocation3], 4294966784 }
 0x31f   :  { %497 = dma.done.wait [#allocation5], 16  }
 0x320   :  { %498 = vsyncadd [#allocation5], 4294967280 }
 0x321   :  { %382 = vsyncpa [#allocation3], 1 }
 0x322   :  { %383 = vsyncpa [#allocation5], 1 }

</bundles_post_ra>
